<compile_context>
chip_gen: v5e
topology: v5e:2x2
jax: 0.10.0
libtpu: 0.0.40
codegen_flags: <defaults>
</compile_context>

<pallas_src>
import functools

import jax
import jax.numpy as jnp
from jax.experimental import pallas as pl
from jax.experimental.pallas import tpu as pltpu

DROPOUT_P = 0.2
N_EMB_D = 32


def ffwd_kernel(x_ref, w1_ref, b1_ref, w2_ref, b2_ref, *rest, apply_dropout):
    if apply_dropout:
        mask_ref, o_ref = rest
    else:
        (o_ref,) = rest

    # --- Linear 1 + ReLU (bf16 MXU inputs, f32 accumulate) ---
    x = x_ref[...]                                                   # (tm, C) f32
    h = jnp.dot(x.astype(jnp.bfloat16), w1_ref[...],
                preferred_element_type=jnp.float32) + b1_ref[...]    # (tm, 4C) f32
    h = jnp.maximum(h, 0.0)

    # --- Linear 2 ---
    y = jnp.dot(h.astype(jnp.bfloat16), w2_ref[...],
                preferred_element_type=jnp.float32) + b2_ref[...]    # (tm, C) f32

    # --- Dropout: mask is pre-scaled by 1/(1-p), so one multiply total ---
    if apply_dropout:
        y = y * mask_ref[...]

    o_ref[...] = y.astype(o_ref.dtype)


def _dropout_mask(key, shape, p):
    """Inverted-dropout keep mask, pre-scaled by 1/(1-p)."""
    keep = jax.random.bernoulli(key, 1.0 - p, shape)
    return keep.astype(jnp.float32) * jnp.float32(1.0 / (1.0 - p))


def feed_forward(x, w1, b1, w2, b2, *, dropout_key=None, dropout_p=DROPOUT_P,
                 training=True, tile_m=512):
    """x: (B, T, C) f32. w1: (C, 4C), b1: (4C,), w2: (4C, C), b2: (C,)."""
    B, T, C = x.shape
    H = w1.shape[1]
    M = B * T

    x2 = x.reshape(M, C)
    b1_2 = b1.reshape(1, H).astype(jnp.float32)
    b2_2 = b2.reshape(1, C).astype(jnp.float32)
    w1_b = w1.astype(jnp.bfloat16)   # halves weight DMA / VMEM footprint
    w2_b = w2.astype(jnp.bfloat16)

    apply_dropout = bool(training) and dropout_p > 0.0

    TILE_M = min(tile_m, M)
    grid = (pl.cdiv(M, TILE_M),)

    in_specs = [
        pl.BlockSpec((TILE_M, C), lambda i: (i, 0)),   # x tile (streamed)
        pl.BlockSpec((C, H), lambda i: (0, 0)),        # w1 (resident)
        pl.BlockSpec((1, H), lambda i: (0, 0)),        # b1 (resident)
        pl.BlockSpec((H, C), lambda i: (0, 0)),        # w2 (resident)
        pl.BlockSpec((1, C), lambda i: (0, 0)),        # b2 (resident)
    ]
    args = [x2, w1_b, b1_2, w2_b, b2_2]

    if apply_dropout:
        if dropout_key is None:
            dropout_key = jax.random.PRNGKey(0)
        mask = _dropout_mask(dropout_key, (M, C), dropout_p)
        in_specs.append(pl.BlockSpec((TILE_M, C), lambda i: (i, 0)))  # mask tile
        args.append(mask)

    kernel = functools.partial(ffwd_kernel, apply_dropout=apply_dropout)

    out = pl.pallas_call(
        kernel,
        out_shape=jax.ShapeDtypeStruct((M, C), jnp.float32),
        grid_spec=pltpu.PrefetchScalarGridSpec(
            num_scalar_prefetch=0,
            grid=grid,
            in_specs=in_specs,
            out_specs=pl.BlockSpec((TILE_M, C), lambda i: (i, 0)),
        ),
        compiler_params=pltpu.CompilerParams(
            dimension_semantics=("parallel",),
            vmem_limit_bytes=32 * 1024 * 1024,
        ),
    )(*args)

    return out.reshape(B, T, C)


if __name__ == "__main__":
    key = jax.random.PRNGKey(0)
    k_x, k_w1, k_b1, k_w2, k_b2, k_drop = jax.random.split(key, 6)

    B, T, C = 2, 8, N_EMB_D
    H = 4 * C

    # Roughly matches torch Linear's uniform init.
    bound1 = 1.0 / (C ** 0.5)
    bound2 = 1.0 / (H ** 0.5)
    w1 = jax.random.uniform(k_w1, (C, H), jnp.float32, -bound1, bound1)
    b1 = jax.random.uniform(k_b1, (H,), jnp.float32, -bound1, bound1)
    w2 = jax.random.uniform(k_w2, (H, C), jnp.float32, -bound2, bound2)
    b2 = jax.random.uniform(k_b2, (C,), jnp.float32, -bound2, bound2)

    x = jax.random.normal(k_x, (B, T, C), jnp.float32)

    # Training mode (dropout active, deterministic key).
    y_train = feed_forward(x, w1, b1, w2, b2, dropout_key=k_drop, training=True)
    jax.block_until_ready(y_train)

    # Eval mode (dropout = identity).
    y_eval = feed_forward(x, w1, b1, w2, b2, training=False)
    jax.block_until_ready(y_eval)

    # Pure-JAX f32 reference (kernel uses bf16 matmul inputs -> loose tol).
    ref = jnp.maximum(x.reshape(-1, C) @ w1 + b1, 0.0) @ w2 + b2
    assert jnp.allclose(y_eval.reshape(-1, C), ref, atol=3e-2, rtol=3e-2), \
        "eval mismatch vs reference"

    # Training reference with the same (reproducible) dropout mask.
    mask = _dropout_mask(k_drop, (B * T, C), DROPOUT_P)
    ref_train = ref * mask
    assert jnp.allclose(y_train.reshape(-1, C), ref_train, atol=3e-2, rtol=3e-2), \
        "train mismatch vs reference"

    assert y_train.shape == (B, T, C)
    print("KERNEL_OK")
</pallas_src>

<mosaic_0001>
module attributes {stable_mosaic.version = 11 : i64} {
  func.func @ffwd_kernel(%arg0: i32, %arg1: memref<16x32xf32, #tpu.memory_space<vmem>>, %arg2: memref<32x128xbf16, #tpu.memory_space<vmem>>, %arg3: memref<1x128xf32, #tpu.memory_space<vmem>>, %arg4: memref<128x32xbf16, #tpu.memory_space<vmem>>, %arg5: memref<1x32xf32, #tpu.memory_space<vmem>>, %arg6: memref<16x32xf32, #tpu.memory_space<vmem>>, %arg7: memref<16x32xf32, #tpu.memory_space<vmem>>) attributes {dimension_semantics = [#tpu.dimension_semantics<parallel>], iteration_bounds = array<i64: 1>, scalar_prefetch = 0 : i64, scratch_operands = 0 : i64, tpu.core_type = #tpu.core_type<tc>, window_params = [{transform_indices = @transform_0, window_bounds = array<i64: 16, 32>}, {pipeline_mode = #tpu.pipeline_mode<synchronous>, transform_indices = @transform_1, window_bounds = array<i64: 32, 128>}, {pipeline_mode = #tpu.pipeline_mode<synchronous>, transform_indices = @transform_2, window_bounds = array<i64: 1, 128>}, {pipeline_mode = #tpu.pipeline_mode<synchronous>, transform_indices = @transform_3, window_bounds = array<i64: 128, 32>}, {pipeline_mode = #tpu.pipeline_mode<synchronous>, transform_indices = @transform_4, window_bounds = array<i64: 1, 32>}, {transform_indices = @transform_5, window_bounds = array<i64: 16, 32>}, {transform_indices = @transform_6, window_bounds = array<i64: 16, 32>}]} {
    %c0 = arith.constant 0 : index
    %c0_0 = arith.constant 0 : index
    %0 = vector.load %arg1[%c0, %c0_0] : memref<16x32xf32, #tpu.memory_space<vmem>>, vector<16x32xf32>
    %1 = arith.truncf %0 : vector<16x32xf32> to vector<16x32xbf16>
    %c0_1 = arith.constant 0 : index
    %c0_2 = arith.constant 0 : index
    %2 = vector.load %arg2[%c0_1, %c0_2] : memref<32x128xbf16, #tpu.memory_space<vmem>>, vector<32x128xbf16>
    %cst = arith.constant dense<0.000000e+00> : vector<16x128xf32>
    %3 = tpu.matmul %1, %2, %cst {dimension_numbers = #tpu.dot_dimension_numbers<[1], [0], [0], [1], [0, 0, 1, 1], [], []>} : vector<16x32xbf16>, vector<32x128xbf16>, vector<16x128xf32> -> vector<16x128xf32>
    %c0_3 = arith.constant 0 : index
    %c0_4 = arith.constant 0 : index
    %4 = vector.load %arg3[%c0_3, %c0_4] : memref<1x128xf32, #tpu.memory_space<vmem>>, vector<1x128xf32>
    %5 = vector.broadcast %4 : vector<1x128xf32> to vector<16x128xf32>
    %6 = arith.addf %3, %5 : vector<16x128xf32>
    %cst_5 = arith.constant 0.000000e+00 : f32
    %7 = vector.broadcast %cst_5 : f32 to vector<16x128xf32>
    %8 = arith.maximumf %6, %7 : vector<16x128xf32>
    %9 = arith.truncf %8 : vector<16x128xf32> to vector<16x128xbf16>
    %c0_6 = arith.constant 0 : index
    %c0_7 = arith.constant 0 : index
    %10 = vector.load %arg4[%c0_6, %c0_7] : memref<128x32xbf16, #tpu.memory_space<vmem>>, vector<128x32xbf16>
    %cst_8 = arith.constant dense<0.000000e+00> : vector<16x32xf32>
    %11 = tpu.matmul %9, %10, %cst_8 {dimension_numbers = #tpu.dot_dimension_numbers<[1], [0], [0], [1], [0, 0, 1, 1], [], []>} : vector<16x128xbf16>, vector<128x32xbf16>, vector<16x32xf32> -> vector<16x32xf32>
    %c0_9 = arith.constant 0 : index
    %c0_10 = arith.constant 0 : index
    %12 = vector.load %arg5[%c0_9, %c0_10] : memref<1x32xf32, #tpu.memory_space<vmem>>, vector<1x32xf32>
    %13 = vector.broadcast %12 : vector<1x32xf32> to vector<16x32xf32>
    %14 = arith.addf %11, %13 : vector<16x32xf32>
    %c0_11 = arith.constant 0 : index
    %c0_12 = arith.constant 0 : index
    %15 = vector.load %arg6[%c0_11, %c0_12] : memref<16x32xf32, #tpu.memory_space<vmem>>, vector<16x32xf32>
    %16 = arith.mulf %14, %15 : vector<16x32xf32>
    %c0_13 = arith.constant 0 : index
    %c0_14 = arith.constant 0 : index
    %17 = vector.load %arg7[%c0_13, %c0_14] : memref<16x32xf32, #tpu.memory_space<vmem>>, vector<16x32xf32>
    tpu.vector_store %arg7[%c0_13, %c0_14], %16 {strides = array<i32>} : memref<16x32xf32, #tpu.memory_space<vmem>>, vector<16x32xf32>,
    return
  }
  func.func @transform_0(%arg0: i32) -> (i32, i32) {
    %c0_i32 = arith.constant 0 : i32
    %c0_i32_0 = arith.constant 0 : i32
    return %arg0, %c0_i32 : i32, i32
  }
  func.func @transform_1(%arg0: i32) -> (i32, i32) {
    %c0_i32 = arith.constant 0 : i32
    %c0_i32_0 = arith.constant 0 : i32
    %c0_i32_1 = arith.constant 0 : i32
    return %c0_i32, %c0_i32_0 : i32, i32
  }
  func.func @transform_2(%arg0: i32) -> (i32, i32) {
    %c0_i32 = arith.constant 0 : i32
    %c0_i32_0 = arith.constant 0 : i32
    %c0_i32_1 = arith.constant 0 : i32
    return %c0_i32, %c0_i32_0 : i32, i32
  }
  func.func @transform_3(%arg0: i32) -> (i32, i32) {
    %c0_i32 = arith.constant 0 : i32
    %c0_i32_0 = arith.constant 0 : i32
    %c0_i32_1 = arith.constant 0 : i32
    return %c0_i32, %c0_i32_0 : i32, i32
  }
  func.func @transform_4(%arg0: i32) -> (i32, i32) {
    %c0_i32 = arith.constant 0 : i32
    %c0_i32_0 = arith.constant 0 : i32
    %c0_i32_1 = arith.constant 0 : i32
    return %c0_i32, %c0_i32_0 : i32, i32
  }
  func.func @transform_5(%arg0: i32) -> (i32, i32) {
    %c0_i32 = arith.constant 0 : i32
    %c0_i32_0 = arith.constant 0 : i32
    return %arg0, %c0_i32 : i32, i32
  }
  func.func @transform_6(%arg0: i32) -> (i32, i32) {
    %c0_i32 = arith.constant 0 : i32
    %c0_i32_0 = arith.constant 0 : i32
    return %arg0, %c0_i32 : i32, i32
  }
}

</mosaic_0001>

<bundles_post_ra>
// kernel: tpu_custom_call.1
= control target key start
LH: loop header
LB: loop body
LE: loop exit
PB: predicated region body
PF: predicated region fallthrough
CT: control target
= control target key end

     0   :  { %s349_s0 = inlined_call_operand.vmem [shape: f32[16,32], index: 0, kind: input, shape index: {}]   ;;  %s350_s1 = inlined_call_operand.vmem [shape: bf16[32,128], index: 1, kind: input, shape index: {}]   ;;  %s351_s2 = inlined_call_operand.vmem [shape: f32[1,128], index: 2, kind: input, shape index: {}]   ;;  %s352_s3 = inlined_call_operand.vmem [shape: bf16[128,32], index: 3, kind: input, shape index: {}]   ;;  %s353_s4 = inlined_call_operand.vmem [shape: f32[1,32], index: 4, kind: input, shape index: {}]   ;;  %s354_s5 = inlined_call_operand.vmem [shape: f32[16,32], index: 5, kind: input, shape index: {}]   ;;  %s355_s6 = inlined_call_operand.hbm [shape: f32[16,32], index: 6, kind: output, shape index: {}]  }
   0x1   :  { %v217_v0 = vld [vmem:[%s350_s1 + $0x8] sm:$0xff]  ;;  %v216_v1 = vld [vmem:[%s350_s1] sm:$0xff]  ;;  %v225_v2 = vld [vmem:[%s352_s3 + $0x38] sm:$0xff] }
   0x2   :  { %58 = vmatpush.bf16.msra.mxu0 %v217_v0  ;;  %v25_v3 = vld [vmem:[%s349_s0] sm:$0xff]  ;;  %v26_v4 = vld [vmem:[%s349_s0 + $0x8] sm:$0xff]  ;;  %137 = vmatpush.bf16.msra.mxu1 %v225_v2  ;;  %v224_v5 = vld [vmem:[%s352_s3 + $0x30] sm:$0xff] }
   0x3   :  { %11 = vsyncpa [#allocation3], 0  ;;  %v27_v6 = vpack.c.bf16 %v26_v4, %v25_v3  ;;  %vm48_vm0 = vcmask 261120   ;;  %v223_v7 = vld [vmem:[%s352_s3 + $0x28] sm:$0xff]  ;;  %v222_v8 = vld [vmem:[%s352_s3 + $0x20] sm:$0xff]  ;;  %s163_s27 = sshll.u32 %s355_s6, 4  ;;  %s164_s27 = int_to_ptr.hbm [resolvable:$true] %s163_s27 }
   0x4   :  { %v221_v9 = vld [vmem:[%s352_s3 + $0x18] sm:$0xff]  ;;  %v220_v10 = vld [vmem:[%s352_s3 + $0x10] sm:$0xff]  ;;  %v219_v11 = vld [vmem:[%s352_s3 + $0x8] sm:$0xff]  ;;  %s259_s30 = smov 8  }
   0x5   :  { %v218_v12 = vld [vmem:[%s352_s3] sm:$0xff]  ;;  %v152_v27 = vld [vmem:[%s354_s5 + $0x8] sm:$0xff] }
   0x6   :  { %59 = vmatpush.bf16.msra.mxu0 %v216_v1  ;;  %138 = vmatpush.bf16.msra.mxu1 %v224_v5  ;;  %v229_v14 = vld [vmem:[%s351_s2] ss:$0 sm:$0xff]  ;;  %s257_s2 = smov [#allocation2]  }
   0x7   :  { %v230_v21 = vld [vmem:[%s353_s4] ss:$0 sm:$0xff]  ;;  %s161_s24 = sshll.u32 %s257_s2, 4  ;;  %s258_s4 = smov 128   ;;  %s162_s24 = int_to_ptr.vmem [resolvable:$true] %s161_s24 }
   0x8   :  { %v151_v23 = vld [vmem:[%s354_s5] sm:$0xff] }
   0x9   :  { %183 = vmatmul.msk.bf16.vlgmr.msra.gmra.mxu0 %vm48_vm0, %v27_v6 }
   0xa   :  { %139 = vmatpush.bf16.msra.mxu1 %v223_v7 }
   0xe   :  { %140 = vmatpush.bf16.msra.mxu1 %v222_v8 }
  0x12   :  { %141 = vmatpush.bf16.msra.mxu1 %v221_v9 }
  0x16   :  { %142 = vmatpush.bf16.msra.mxu1 %v220_v10 }
  0x1a   :  { %143 = vmatpush.bf16.msra.mxu1 %v219_v11 }
  0x1e   :  { %144 = vmatpush.bf16.msra.mxu1 %v218_v12 }
  0x86   :  { %v61_v13 = vpop.f32.mrf.mxu0 }
  0x87   :  { %v62_v15 = vadd.f32 %v229_v14, %v61_v13 }
  0x89   :  { %v66_v18 = vmax.f32 %v62_v15, 0.0 }
  0x8e   :  { %v63_v16 = vpop.f32.mrf.mxu0 }
  0x8f   :  { %v64_v17 = vadd.f32 %v229_v14, %v63_v16 }
  0x91   :  { %v67_v19 = vmax.f32 %v64_v17, 0.0 }
  0x93   :  { %v68_v20 = vpack.c.bf16 %v67_v19, %v66_v18 }
  0x95   :  { %145 = vmatmul.bf16.vlgmr.msra.gmra.mxu1 %v68_v20 }
 0x112   :  { %v146_v22 = vpop.f32.mrf.mxu1 }
 0x113   :  { %v147_v24 = vadd.f32 %v230_v21, %v146_v22 }
 0x115   :  { %v153_v25 = vmul.f32 %v151_v23, %v147_v24 }
 0x117   :  { %155 = vst.msk [vmem:[#allocation2] sm:$0xff] %vm48_vm0, %v153_v25 }
 0x11a   :  { %v148_v26 = vpop.f32.mrf.mxu1 }
 0x11b   :  { %v149_v28 = vadd.f32 %v230_v21, %v148_v26 }
 0x11d   :  { %v154_v29 = vmul.f32 %v152_v27, %v149_v28 }
 0x11f   :  { %156 = vst.msk [vmem:[#allocation2 + $0x8] sm:$0xff] %vm48_vm0, %v154_v29 }
 0x120   :  { %169 = dma.vmem_to_hbm [thread:$0]  %s162_s24, 256, %s164_s27, [#allocation3], %s258_s4, %s258_s4, %s259_s30  }
 0x121   :  { %255 = dma.done.wait [#allocation3], 256  }
 0x122   :  { %256 = vsyncadd [#allocation3], 4294967040 }
 0x123   :  { %174 = vsyncpa [#allocation3], 1 }

</bundles_post_ra>
